<compile_context>
chip_gen: v6e
topology: v6e:2x2x1
jax: 0.10.0
libtpu: 0.0.40
codegen_flags: <defaults>
</compile_context>

<pallas_src>
import functools
import math

import jax
import jax.numpy as jnp
from jax.experimental import pallas as pl
from jax.experimental.pallas import tpu as pltpu


def _choose_pack(emb_dim, freq):
    """Largest number of frequency streams packed side-by-side on the 128 lanes."""
    max_pack = max(1, 128 // emb_dim)
    for p in range(min(max_pack, freq), 0, -1):
        if freq % p == 0:
            return p
    return 1


def _choose_groups_per_chunk(g_total, seq_len, max_rows=2048, min_rows=256):
    """Pick groups-per-grid-step so rows-per-step lands in the MXU/DMA sweet spot.

    Must divide g_total; partial blocks (groups_per_chunk != g_total) must keep the
    second-to-last block dim (rows) a multiple of 8 for the (8,128) tiling rule.
    """
    candidates = []
    for d in range(1, g_total + 1):
        if g_total % d:
            continue
        rows = d * seq_len
        if rows > max_rows:
            continue
        if d != g_total and rows % 8:
            continue
        candidates.append(d)
    if not candidates:
        return 1 if (seq_len % 8 == 0) else g_total
    big = [d for d in candidates if d * seq_len >= min_rows]
    return max(big) if big else max(candidates)


def _stream_fusion_kernel(qa_ref, x_ref, w_ref, b_ref, out_ref, *, n_groups, seq_len):
    PC = out_ref.shape[2]          # pack * emb_dim (lane width)
    f32 = jnp.float32
    bf16 = jnp.bfloat16

    x = x_ref[0]                   # (rows, PC)  bf16 packed esti streams
    qa = qa_ref[0]                 # (2, PC)     f32: row 0 = scaled query, row 1 = raw aux
    q = qa[0:1, :]                 # (1, PC)  scale 1/sqrt(head_dim) already folded in
    aux = qa[1:2, :]               # (1, PC)

    # Coalesced weights (bf16): [Wk | Wv | Wo | Wf_esti | Wf_aux | head_indicator]
    wkv = w_ref[:, 0 * PC:2 * PC]
    wo = w_ref[:, 2 * PC:3 * PC]
    wf1 = w_ref[:, 3 * PC:4 * PC]
    wf2 = w_ref[:, 4 * PC:5 * PC]
    head_outer = w_ref[:, 5 * PC:6 * PC]   # 0/1 block-diag per-head indicator

    # ---- fused K/V projection: one (rows, PC) @ (PC, 2PC) bf16 matmul, f32 acc
    kv = jnp.dot(x, wkv, preferred_element_type=f32) + b_ref[0:1, :]
    k = kv[:, :PC]
    v = kv[:, PC:]

    # ---- rank-1-query attention: per-(stream, t, head) scores via head indicator
    qk = (k * q).astype(bf16)                                        # VPU mul + cast
    scores = jnp.dot(qk, head_outer, preferred_element_type=f32)     # (rows, PC)

    # softmax over time (per stream-group, per head lane)
    s3 = scores.reshape(n_groups, seq_len, PC)
    m = jnp.max(s3, axis=1, keepdims=True)
    e = jnp.exp(s3 - m)
    denom = jnp.sum(e, axis=1, keepdims=True)
    inv = pl.reciprocal(denom, approx=True)                          # EUP seed ...
    inv = inv * (2.0 - denom * inv)                                  # ... + 1 Newton step
    p3 = e * inv                                                     # (n_groups, T, PC)

    v3 = v.reshape(n_groups, seq_len, PC)
    attn = jnp.sum(p3 * v3, axis=1)                                  # (n_groups, PC)

    # ---- out-proj + residual (aux + aux_adapt): still one row per stream group
    o = jnp.dot(attn.astype(bf16), wo, preferred_element_type=f32) + b_ref[1:2, :PC]
    aux_out = aux + o                                                # (n_groups, PC)

    # ---- 1x1 fusion conv over [esti ; aux]: esti half full-rank, aux half rank-1 in T
    part_esti = jnp.dot(x, wf1, preferred_element_type=f32)                        # (rows, PC)
    part_aux = jnp.dot(aux_out.astype(bf16), wf2, preferred_element_type=f32)      # (n_groups, PC)
    fused = (part_esti.reshape(n_groups, seq_len, PC)
             + part_aux[:, None, :]
             + b_ref[2:3, :PC])
    out_ref[0] = fused.reshape(n_groups * seq_len, PC).astype(out_ref.dtype)


def stream_fusion_forward(aux, esti, params, *, nhead, max_rows_per_step=2048):
    """aux: (B, C), esti: (B, C, T, F) -> (B, C, T, F). Matches the PyTorch module (eval)."""
    B, C, T, F = esti.shape
    assert C % nhead == 0
    head_dim = C // nhead
    f32 = jnp.float32
    bf16 = jnp.bfloat16

    # ---- lane packing: put `pack` frequency streams side-by-side on the lanes
    pack = _choose_pack(C, F)
    PC = pack * C
    G = F // pack
    groups_per_chunk = _choose_groups_per_chunk(G, T, max_rows=max_rows_per_step)
    n_chunks = G // groups_per_chunk
    rows_chunk = groups_per_chunk * T

    # ---- layout: (B, C, T, F) -> (B, G*T, pack*C), bf16 activations for the MXU
    esti_p = (esti.reshape(B, C, T, G, pack)
                  .transpose(0, 3, 2, 4, 1)        # (B, G, T, pack, C)
                  .reshape(B, G * T, PC)).astype(bf16)

    # ---- parameters: pre-transpose, block-diag lane-pack, coalesce -----------
    wq, wk, wv = jnp.split(params["in_proj_w"], 3, axis=0)
    bq, bk, bv = jnp.split(params["in_proj_b"], 3)
    scale = 1.0 / math.sqrt(head_dim)

    # Rank-1 query projected in the wrapper (tiny (B,C)x(C,C) XLA matmul), scale folded in.
    q = (aux.astype(f32) @ wq.T.astype(f32) + bq.astype(f32)) * scale        # (B, C)
    tile_row = lambda r: jnp.tile(r.reshape(-1, C).astype(f32), (1, pack))   # (B, PC)
    qa_p = jnp.stack([tile_row(q), tile_row(aux)], axis=1)                   # (B, 2, PC) f32

    eye = jnp.eye(pack, dtype=f32)
    bd = lambda w_t: jnp.kron(eye, w_t.astype(f32))       # same W for every packed stream
    lane_head = jnp.arange(PC) // head_dim
    head_outer = (lane_head[:, None] == lane_head[None, :]).astype(f32)      # 0/1, exact in bf16
    wfus = params["fusion_w"][:, :, 0, 0]                                    # (C, 2C) 1x1 conv

    w_all = jnp.concatenate([
        bd(wk.T), bd(wv.T),                    # fused K/V projection
        bd(params["out_proj_w"].T),            # attention out-proj
        bd(wfus[:, :C].T), bd(wfus[:, C:].T),  # fusion conv: esti half, aux half
        head_outer,                            # block-diag per-head indicator
    ], axis=1).astype(bf16)                    # (PC, 6*PC)

    tile_b = lambda b: jnp.tile(b.reshape(1, C).astype(f32), (1, pack))
    zero = jnp.zeros((1, PC), f32)
    bias_pack = jnp.concatenate([
        jnp.concatenate([tile_b(bk), tile_b(bv)], axis=1),                    # row 0: [bk | bv]
        jnp.concatenate([tile_b(params["out_proj_b"]), zero], axis=1),        # row 1: [bo | 0 ]
        jnp.concatenate([tile_b(params["fusion_b"]), zero], axis=1),          # row 2: [bf | 0 ]
        jnp.zeros((5, 2 * PC), f32),                                          # pad to 8 sublanes
    ], axis=0)                                                                # (8, 2PC) f32

    kernel = functools.partial(_stream_fusion_kernel,
                               n_groups=groups_per_chunk, seq_len=T)

    out_p = pl.pallas_call(
        kernel,
        out_shape=jax.ShapeDtypeStruct((B, G * T, PC), esti.dtype),
        grid=(B, n_chunks),
        in_specs=[
            pl.BlockSpec((1, 2, PC), lambda i, g: (i, 0, 0)),          # [query ; aux] rows
            pl.BlockSpec((1, rows_chunk, PC), lambda i, g: (i, g, 0)),  # packed esti (bf16)
            pl.BlockSpec((PC, 6 * PC), lambda i, g: (0, 0)),            # coalesced weights (bf16)
            pl.BlockSpec((8, 2 * PC), lambda i, g: (0, 0)),             # coalesced biases (f32)
        ],
        out_specs=pl.BlockSpec((1, rows_chunk, PC), lambda i, g: (i, g, 0)),
        compiler_params=pltpu.CompilerParams(
            dimension_semantics=("parallel", "parallel"),
            vmem_limit_bytes=48 * 1024 * 1024),
    )(qa_p, esti_p, w_all, bias_pack)

    # ---- unpack: (B, G*T, PC) -> (B, C, T, F)
    out = (out_p.reshape(B, G, T, pack, C)
                .transpose(0, 4, 2, 1, 3)          # (B, C, T, G, pack)
                .reshape(B, C, T, F))
    return out


def _reference_forward(aux, esti, params, *, nhead):
    """Pure-JAX reference of the PyTorch forward (eval mode), for verification."""
    B, C, T, F = esti.shape
    BF = B * F
    hd = C // nhead
    esti_flat = jnp.transpose(esti, (0, 3, 2, 1)).reshape(BF, T, C)
    aux_rep = jnp.repeat(aux, F, axis=0)[:, None, :].repeat(T, axis=1)    # (BF, T, C)

    wq, wk, wv = jnp.split(params["in_proj_w"], 3, axis=0)
    bq, bk, bv = jnp.split(params["in_proj_b"], 3)
    q = aux_rep @ wq.T + bq
    k = esti_flat @ wk.T + bk
    v = esti_flat @ wv.T + bv
    q = q.reshape(BF, T, nhead, hd).transpose(0, 2, 1, 3)
    k = k.reshape(BF, T, nhead, hd).transpose(0, 2, 1, 3)
    v = v.reshape(BF, T, nhead, hd).transpose(0, 2, 1, 3)
    s = jnp.einsum("bhqd,bhkd->bhqk", q, k) / math.sqrt(hd)
    p = jax.nn.softmax(s, axis=-1)
    o = jnp.einsum("bhqk,bhkd->bhqd", p, v).transpose(0, 2, 1, 3).reshape(BF, T, C)
    o = o @ params["out_proj_w"].T + params["out_proj_b"]
    aux_out = aux_rep + o
    aux_nchw = aux_out.reshape(B, F, T, C).transpose(0, 3, 2, 1)
    cat = jnp.concatenate([esti, aux_nchw], axis=1)                       # (B, 2C, T, F)
    wfus = params["fusion_w"][:, :, 0, 0]
    fused = jnp.einsum("oc,bctf->botf", wfus, cat) + params["fusion_b"][None, :, None, None]
    return fused


if __name__ == "__main__":
    B, C, T, F = 2, 32, 8, 16          # emb_dim=32, nhead=4 -> head_dim=8
    nhead = 4

    key = jax.random.PRNGKey(0)
    keys = jax.random.split(key, 8)
    aux = jax.random.normal(keys[0], (B, C), jnp.float32)
    esti = jax.random.normal(keys[1], (B, C, T, F), jnp.float32)

    s = 0.05
    params = {
        "in_proj_w": jax.random.normal(keys[2], (3 * C, C), jnp.float32) * s,
        "in_proj_b": jax.random.normal(keys[3], (3 * C,), jnp.float32) * s,
        "out_proj_w": jax.random.normal(keys[4], (C, C), jnp.float32) * s,
        "out_proj_b": jax.random.normal(keys[5], (C,), jnp.float32) * s,
        "fusion_w": jax.random.normal(keys[6], (C, 2 * C, 1, 1), jnp.float32) * s,
        "fusion_b": jax.random.normal(keys[7], (C,), jnp.float32) * s,
    }

    ref = jax.block_until_ready(_reference_forward(aux, esti, params, nhead=nhead))

    out = jax.block_until_ready(stream_fusion_forward(aux, esti, params, nhead=nhead))
    assert out.shape == (B, C, T, F)
    # bf16 MXU operands (f32 accumulation) -> relaxed tolerance vs. the f32 reference.
    assert jnp.allclose(out, ref, atol=2e-2, rtol=2e-2), "mismatch vs. JAX reference"

    # Exercise the multi-chunk grid path (grid=(B, 2)) at the same small shape.
    out2 = jax.block_until_ready(
        stream_fusion_forward(aux, esti, params, nhead=nhead, max_rows_per_step=16))
    assert jnp.allclose(out2, ref, atol=2e-2, rtol=2e-2), "mismatch (chunked grid)"

    print("KERNEL_OK")
</pallas_src>

<mosaic_0001>
module attributes {stable_mosaic.version = 11 : i64} {
  func.func @_stream_fusion_kernel(%arg0: i32, %arg1: i32, %arg2: memref<1x2x128xf32, #tpu.memory_space<vmem>>, %arg3: memref<1x32x128xbf16, #tpu.memory_space<vmem>>, %arg4: memref<128x768xbf16, #tpu.memory_space<vmem>>, %arg5: memref<8x256xf32, #tpu.memory_space<vmem>>, %arg6: memref<1x32x128xf32, #tpu.memory_space<vmem>>) attributes {dimension_semantics = [#tpu.dimension_semantics<parallel>, #tpu.dimension_semantics<parallel>], iteration_bounds = array<i64: 2, 1>, scalar_prefetch = 0 : i64, scratch_operands = 0 : i64, tpu.core_type = #tpu.core_type<tc>, window_params = [{transform_indices = @transform_0, window_bounds = array<i64: 1, 2, 128>}, {transform_indices = @transform_1, window_bounds = array<i64: 1, 32, 128>}, {pipeline_mode = #tpu.pipeline_mode<synchronous>, transform_indices = @transform_2, window_bounds = array<i64: 128, 768>}, {pipeline_mode = #tpu.pipeline_mode<synchronous>, transform_indices = @transform_3, window_bounds = array<i64: 8, 256>}, {transform_indices = @transform_4, window_bounds = array<i64: 1, 32, 128>}]} {
    %c0 = arith.constant 0 : index
    %c0_0 = arith.constant 0 : index
    %c0_1 = arith.constant 0 : index
    %0 = vector.load %arg3[%c0, %c0_0, %c0_1] : memref<1x32x128xbf16, #tpu.memory_space<vmem>>, vector<1x32x128xbf16>
    %1 = vector.shape_cast %0 : vector<1x32x128xbf16> to vector<32x128xbf16>
    %c0_2 = arith.constant 0 : index
    %c0_3 = arith.constant 0 : index
    %c0_4 = arith.constant 0 : index
    %2 = vector.load %arg2[%c0_2, %c0_3, %c0_4] : memref<1x2x128xf32, #tpu.memory_space<vmem>>, vector<1x2x128xf32>
    %3 = vector.shape_cast %2 : vector<1x2x128xf32> to vector<2x128xf32>
    %4 = vector.extract_strided_slice %3 {offsets = [0, 0], sizes = [1, 128], strides = [1, 1]} : vector<2x128xf32> to vector<1x128xf32>
    %5 = vector.extract_strided_slice %3 {offsets = [1, 0], sizes = [1, 128], strides = [1, 1]} : vector<2x128xf32> to vector<1x128xf32>
    %c0_5 = arith.constant 0 : index
    %c0_6 = arith.constant 0 : index
    %6 = vector.load %arg4[%c0_5, %c0_6] : memref<128x768xbf16, #tpu.memory_space<vmem>>, vector<128x256xbf16>
    %c0_7 = arith.constant 0 : index
    %c256 = arith.constant 256 : index
    %7 = vector.load %arg4[%c0_7, %c256] : memref<128x768xbf16, #tpu.memory_space<vmem>>, vector<128x128xbf16>
    %c0_8 = arith.constant 0 : index
    %c384 = arith.constant 384 : index
    %8 = vector.load %arg4[%c0_8, %c384] : memref<128x768xbf16, #tpu.memory_space<vmem>>, vector<128x128xbf16>
    %c0_9 = arith.constant 0 : index
    %c512 = arith.constant 512 : index
    %9 = vector.load %arg4[%c0_9, %c512] : memref<128x768xbf16, #tpu.memory_space<vmem>>, vector<128x128xbf16>
    %c0_10 = arith.constant 0 : index
    %c640 = arith.constant 640 : index
    %10 = vector.load %arg4[%c0_10, %c640] : memref<128x768xbf16, #tpu.memory_space<vmem>>, vector<128x128xbf16>
    %cst = arith.constant dense<0.000000e+00> : vector<32x256xf32>
    %11 = tpu.matmul %1, %6, %cst {dimension_numbers = #tpu.dot_dimension_numbers<[1], [0], [0], [1], [0, 0, 1, 1], [], []>} : vector<32x128xbf16>, vector<128x256xbf16>, vector<32x256xf32> -> vector<32x256xf32>
    %c0_11 = arith.constant 0 : index
    %c0_12 = arith.constant 0 : index
    %12 = vector.load %arg5[%c0_11, %c0_12] : memref<8x256xf32, #tpu.memory_space<vmem>>, vector<1x256xf32>
    %13 = vector.broadcast %12 : vector<1x256xf32> to vector<32x256xf32>
    %14 = arith.addf %11, %13 : vector<32x256xf32>
    %15 = vector.extract_strided_slice %14 {offsets = [0, 0], sizes = [32, 128], strides = [1, 1]} : vector<32x256xf32> to vector<32x128xf32>
    %16 = vector.extract_strided_slice %14 {offsets = [0, 128], sizes = [32, 128], strides = [1, 1]} : vector<32x256xf32> to vector<32x128xf32>
    %17 = vector.broadcast %4 : vector<1x128xf32> to vector<32x128xf32>
    %18 = arith.mulf %15, %17 : vector<32x128xf32>
    %19 = arith.truncf %18 : vector<32x128xf32> to vector<32x128xbf16>
    %cst_13 = arith.constant dense<0.000000e+00> : vector<32x128xf32>
    %20 = tpu.matmul %19, %10, %cst_13 {dimension_numbers = #tpu.dot_dimension_numbers<[1], [0], [0], [1], [0, 0, 1, 1], [], []>} : vector<32x128xbf16>, vector<128x128xbf16>, vector<32x128xf32> -> vector<32x128xf32>
    %21 = vector.shape_cast %20 : vector<32x128xf32> to vector<4x8x128xf32>
    %cst_14 = arith.constant dense<0xFF800000> : vector<4x128xf32>
    %22 = vector.multi_reduction <maximumf>, %21, %cst_14 [1] : vector<4x8x128xf32> to vector<4x128xf32>
    %23 = vector.shape_cast %22 : vector<4x128xf32> to vector<4x1x128xf32>
    %24 = vector.broadcast %23 : vector<4x1x128xf32> to vector<4x8x128xf32>
    %25 = arith.subf %21, %24 : vector<4x8x128xf32>
    %26 = math.exp %25 : vector<4x8x128xf32>
    %cst_15 = arith.constant dense<0.000000e+00> : vector<4x128xf32>
    %27 = vector.multi_reduction <add>, %26, %cst_15 [1] : vector<4x8x128xf32> to vector<4x128xf32>
    %28 = vector.shape_cast %27 : vector<4x128xf32> to vector<4x1x128xf32>
    %29 = tpu.reciprocal %28 {approx = true} : vector<4x1x128xf32> -> vector<4x1x128xf32>
    %30 = arith.mulf %28, %29 : vector<4x1x128xf32>
    %cst_16 = arith.constant 2.000000e+00 : f32
    %31 = vector.broadcast %cst_16 : f32 to vector<4x1x128xf32>
    %32 = arith.subf %31, %30 : vector<4x1x128xf32>
    %33 = arith.mulf %29, %32 : vector<4x1x128xf32>
    %34 = vector.broadcast %33 : vector<4x1x128xf32> to vector<4x8x128xf32>
    %35 = arith.mulf %26, %34 : vector<4x8x128xf32>
    %36 = vector.shape_cast %16 : vector<32x128xf32> to vector<4x8x128xf32>
    %37 = arith.mulf %35, %36 : vector<4x8x128xf32>
    %cst_17 = arith.constant dense<0.000000e+00> : vector<4x128xf32>
    %38 = vector.multi_reduction <add>, %37, %cst_17 [1] : vector<4x8x128xf32> to vector<4x128xf32>
    %39 = arith.truncf %38 : vector<4x128xf32> to vector<4x128xbf16>
    %cst_18 = arith.constant dense<0.000000e+00> : vector<4x128xf32>
    %40 = tpu.matmul %39, %7, %cst_18 {dimension_numbers = #tpu.dot_dimension_numbers<[1], [0], [0], [1], [0, 0, 1, 1], [], []>} : vector<4x128xbf16>, vector<128x128xbf16>, vector<4x128xf32> -> vector<4x128xf32>
    %c1 = arith.constant 1 : index
    %c0_19 = arith.constant 0 : index
    %41 = vector.load %arg5[%c1, %c0_19] : memref<8x256xf32, #tpu.memory_space<vmem>>, vector<1x128xf32>
    %42 = vector.broadcast %41 : vector<1x128xf32> to vector<4x128xf32>
    %43 = arith.addf %40, %42 : vector<4x128xf32>
    %44 = vector.broadcast %5 : vector<1x128xf32> to vector<4x128xf32>
    %45 = arith.addf %44, %43 : vector<4x128xf32>
    %cst_20 = arith.constant dense<0.000000e+00> : vector<32x128xf32>
    %46 = tpu.matmul %1, %8, %cst_20 {dimension_numbers = #tpu.dot_dimension_numbers<[1], [0], [0], [1], [0, 0, 1, 1], [], []>} : vector<32x128xbf16>, vector<128x128xbf16>, vector<32x128xf32> -> vector<32x128xf32>
    %47 = arith.truncf %45 : vector<4x128xf32> to vector<4x128xbf16>
    %cst_21 = arith.constant dense<0.000000e+00> : vector<4x128xf32>
    %48 = tpu.matmul %47, %9, %cst_21 {dimension_numbers = #tpu.dot_dimension_numbers<[1], [0], [0], [1], [0, 0, 1, 1], [], []>} : vector<4x128xbf16>, vector<128x128xbf16>, vector<4x128xf32> -> vector<4x128xf32>
    %49 = vector.shape_cast %46 : vector<32x128xf32> to vector<4x8x128xf32>
    %50 = vector.shape_cast %48 : vector<4x128xf32> to vector<4x1x128xf32>
    %51 = vector.broadcast %50 : vector<4x1x128xf32> to vector<4x8x128xf32>
    %52 = arith.addf %49, %51 : vector<4x8x128xf32>
    %c2 = arith.constant 2 : index
    %c0_22 = arith.constant 0 : index
    %53 = vector.load %arg5[%c2, %c0_22] : memref<8x256xf32, #tpu.memory_space<vmem>>, vector<1x128xf32>
    %54 = vector.shape_cast %53 : vector<1x128xf32> to vector<1x1x128xf32>
    %55 = vector.broadcast %54 : vector<1x1x128xf32> to vector<4x8x128xf32>
    %56 = arith.addf %52, %55 : vector<4x8x128xf32>
    %57 = vector.shape_cast %56 : vector<4x8x128xf32> to vector<32x128xf32>
    %c0_23 = arith.constant 0 : index
    %c0_24 = arith.constant 0 : index
    %c0_25 = arith.constant 0 : index
    %58 = vector.load %arg6[%c0_23, %c0_24, %c0_25] : memref<1x32x128xf32, #tpu.memory_space<vmem>>, vector<1x32x128xf32>
    %59 = vector.shape_cast %58 : vector<1x32x128xf32> to vector<32x128xf32>
    %60 = vector.shape_cast %57 : vector<32x128xf32> to vector<1x32x128xf32>
    tpu.vector_store %arg6[%c0_23, %c0_24, %c0_25], %60 {strides = array<i32>} : memref<1x32x128xf32, #tpu.memory_space<vmem>>, vector<1x32x128xf32>,
    return
  }
  func.func @transform_0(%arg0: i32, %arg1: i32) -> (i32, i32, i32) {
    %c0_i32 = arith.constant 0 : i32
    %c0_i32_0 = arith.constant 0 : i32
    %c0_i32_1 = arith.constant 0 : i32
    return %arg0, %c0_i32, %c0_i32_0 : i32, i32, i32
  }
  func.func @transform_1(%arg0: i32, %arg1: i32) -> (i32, i32, i32) {
    %c0_i32 = arith.constant 0 : i32
    %c0_i32_0 = arith.constant 0 : i32
    return %arg0, %arg1, %c0_i32 : i32, i32, i32
  }
  func.func @transform_2(%arg0: i32, %arg1: i32) -> (i32, i32) {
    %c0_i32 = arith.constant 0 : i32
    %c0_i32_0 = arith.constant 0 : i32
    %c0_i32_1 = arith.constant 0 : i32
    return %c0_i32, %c0_i32_0 : i32, i32
  }
  func.func @transform_3(%arg0: i32, %arg1: i32) -> (i32, i32) {
    %c0_i32 = arith.constant 0 : i32
    %c0_i32_0 = arith.constant 0 : i32
    %c0_i32_1 = arith.constant 0 : i32
    return %c0_i32, %c0_i32_0 : i32, i32
  }
  func.func @transform_4(%arg0: i32, %arg1: i32) -> (i32, i32, i32) {
    %c0_i32 = arith.constant 0 : i32
    %c0_i32_0 = arith.constant 0 : i32
    return %arg0, %arg1, %c0_i32 : i32, i32, i32
  }
}

</mosaic_0001>

<bundles_post_ra>
// kernel: tpu_custom_call.1
= control target key start
LH: loop header
LB: loop body
LE: loop exit
PB: predicated region body
PF: predicated region fallthrough
CT: control target
= control target key end

     0   :  { %s2140_s0 = inlined_call_operand.hbm [shape: f32[2,2,128], index: 0, kind: input, shape index: {}]   ;;  %s2141_s1 = inlined_call_operand.hbm [shape: bf16[2,32,128], index: 1, kind: input, shape index: {}]   ;;  %s2142_s2 = inlined_call_operand.hbm [shape: bf16[128,768], index: 2, kind: input, shape index: {}]   ;;  %s2143_s3 = inlined_call_operand.hbm [shape: f32[8,256], index: 3, kind: input, shape index: {}]   ;;  %s2144_s4 = inlined_call_operand.hbm [shape: f32[2,32,128], index: 4, kind: output, shape index: {}]  }
   0x1   :  { %2146 = sst [smem:[#allocation16_spill]] %s2140_s0 }
   0x2   :  { %2147 = sst [smem:[#allocation17_spill]] %s2142_s2 }
   0x3   :  { %2148 = sst [smem:[#allocation18_spill]] %s2143_s3 }
   0x4   :  { %9 = vsyncpa [#allocation3], 0 }
   0x5   :  { %11 = vsyncpa [#allocation3 + $0x1], 0 }
   0x6   :  { %12 = vsyncpa [#allocation6], 0 }
   0x7   :  { %14 = vsyncpa [#allocation6 + $0x1], 0 }
   0x8   :  { %15 = vsyncpa [#allocation9], 0 }
   0x9   :  { %16 = vsyncpa [#allocation4], 0 }
   0xa   :  { %18 = vsyncpa [#allocation4 + $0x1], 0  ;;  %s1867_s15 = smov 0   ;;  %s1869_s16 = smov 0  }
   0xb   :  { %s1871_s17 = smov 0   ;;  %s1873_s18 = smov 0  }
   0xc   :  { %s1875_s19 = smov 0   ;;  %s1877_s20 = smov 0  }
   0xd LB: > { %s1898_s21 = sadd.s32 4294967295, %s1825_s20   ;;  %s1262_s22 = sadd.s32 4294967294, %s1825_s20   ;;  %s1825_s20 = sphi %s1877_s20, %s24_s20   ;;  %s1821_s19 = sphi %s1875_s19, %s2169_s19   ;;  %s1817_s18 = sphi %s1873_s18, %s2168_s18   ;;  %s1813_s17 = sphi %s1871_s17, %s2167_s17   ;;  %s1809_s16 = sphi %s1869_s16, %s2166_s16   ;;  %s1805_s15 = sphi %s1867_s15, %s2165_s15  }
   0xe   : > { %p56_p0 = scmp.ne.s32.totalorder %s1809_s16, %s1805_s15  ;;  %p2145_p1 = scmp.eq.s32.totalorder %s1898_s21, 0 }
   0xf   : > { %p158_p3 = scmp.eq.s32.totalorder %s1262_s22, 1  ;;  %p1263_p5 = scmp.ge.s32.totalorder %s1825_s20, 1 }
  0x10   : > { %p1907_p4 = por %p2145_p1, %p56_p0  ;;  %p165_p7 = scmp.lt.s32.totalorder %s1825_s20, 3 }
  0x11   : > { %p1912_p6 = por %p158_p3, %p56_p0  ;;  %s1827_s26 = smov [#allocation7]  }
  0x12   : > { %p1917_p8 = pnand %p1263_p5, %p165_p7  ;;  %s177_s27 = sshll.u32 %s1827_s26, 4  ;;  %s178_s27 = int_to_ptr.vmem [resolvable:$true] %s177_s27 }
  0x13   : > { %s2150_s24 = scalar_select %p1912_p6, 1, 0 }
  0x14   : > { %p1467_p9 = pneg %p1917_p8  ;;  %s1828_s29 = smov [#allocation8]  }
  0x15   : > { %s191_s30 = sshll.u32 %s1828_s29, 4  ;;  %s1636_s5 = scalar_lea.vmem %s178_s27, 6144  ;;  %s192_s30 = int_to_ptr.vmem [resolvable:$true] %s191_s30 }
  0x16   : > { %p1926_p11 = pnand %p1467_p9, %p2145_p1  ;;  %p1637_p13 = scmp.ne.s32.totalorder %s178_s27, %s1636_s5 }
  0x17   : > { %p1644_p5 = scmp.lt.s32.totalorder %s178_s27, %s178_s27  ;;  %p1645_p7 = scmp.lt.s32.totalorder %s1636_s5, %s1636_s5 }
  0x18   : > { %p1627_p12 = pneg %p1926_p11 }
  0x19   : > { %p1646_p10 = por %p1645_p7, %p1644_p5 }
  0x1a   : > { %p1639_p0 = pnand %p1637_p13, %p1627_p12 }
  0x1c   : > { %p1640_p3 = pneg %p1639_p0 }
  0x1e   : > { %p1647_p9 = pnand %p1646_p10, %p1640_p3 }
  0x20   : > { %1650 = shalt.err (!%p1647_p9)
}
  0x21   : > { %s1829_s6 = smov 384   ;;  %s1830_s7 = smov 24  }
  0x22   : > { %s2153_s2 = sld [smem:[#allocation17_spill]]  ;;  %s1662_s10 = scalar_lea.vmem %s192_s30, 256 }
  0x23   : > { %p1663_p1 = scmp.ne.s32.totalorder %s192_s30, %s1662_s10  ;;  %p1670_p2 = scmp.lt.s32.totalorder %s192_s30, %s192_s30 }
  0x24   : > { %p1671_p6 = scmp.lt.s32.totalorder %s1662_s10, %s1662_s10 }
  0x25   : > { %p1665_p13 = pnand %p1663_p1, %p1627_p12 }
  0x26   : > { %p1672_p5 = por %p1671_p6, %p1670_p2 }
  0x27   : > { %p1666_p0 = pneg %p1665_p13 }
  0x28   : > { %1470 = dma.hbm_to_vmem [thread:$0]  (!%p1926_p11), %s2153_s2, 6144, %s178_s27, [#allocation6], %s1829_s6, %s1829_s6, %s1830_s7  }
  0x29   : > { %p1673_p10 = pnand %p1672_p5, %p1666_p0 }
  0x2b   : > { %1676 = shalt.err (!%p1673_p10)
}
  0x2c   : > { %s2154_s3 = sld [smem:[#allocation18_spill]]  ;;  %s36_s13 = sadd.s32 1, %s1821_s19 }
  0x2d   : > { %s43_s14 = sadd.s32 1, %s1813_s17  ;;  %p38_p1 = scmp.ge.s32.totalorder %s36_s13, 2 }
  0x2e   : > { %p50_p2 = scmp.ne.s32.totalorder %s1813_s17, %s1809_s16  ;;  %p51_p6 = scmp.eq.s32.totalorder %s1825_s20, 0 }
  0x2f   : > { %p1487_p12 = scmp.lt.s32.totalorder %s1825_s20, 2  ;;  %s2171_s13 = smov (%p38_p1, %s36_s13), 0 }
  0x30   : > { %p52_p3 = por %p51_p6, %p50_p2  ;;  %p2155_p7 = scmp.eq.s32.totalorder %s1898_s21, 1 }
  0x31   : > { %s40_s26 = ssub.s32 %s1821_s19, %s2171_s13  ;;  %s202_s27 = sand.u32 1, %s1813_s17  }
  0x32   : > { %1473 = dma.hbm_to_vmem [thread:$0]  (!%p1926_p11), %s2154_s3, 256, %s192_s30, [#allocation9]  }
  0x33   : > { %p1958_p9 = por %p2155_p7, %p50_p2  ;;  %p41_p13 = scmp.eq.s32.totalorder %s40_s26, 0 }
  0x34   : > { %s1267_s28 = sshll.u32 %s202_s27, 1  ;;  %s1268_s29 = sshll.u32 %s1821_s19, 5 }
  0x35   : > { %s1967_s30 = scalar_select %p41_p13, %s1813_s17, %s43_s14  }
  0x36   : > { %s2157_s0 = sld [smem:[#allocation16_spill]]  ;;  %s206_s8 = scalar_lea.vmem [#allocation2], %s1267_s28 }
  0x37   : > { %s213_s9 = sshll.u32 %s206_s8, 4  ;;  %p1974_p11 = pnand %p1487_p12, %p52_p3  ;;  %s214_s9 = int_to_ptr.vmem [resolvable:$true] %s213_s9 }
  0x38   : > { %s1269_s11 = sshll.u32 %s202_s27, 4  ;;  %s203_s12 = scalar_lea.sflag [#allocation3], %s202_s27 }
  0x39   : > { %p1679_p0 = pneg %p1974_p11  ;;  %s1690_s14 = scalar_lea.vmem %s214_s9, 32 }
  0x3a   : > { %p1691_p5 = scmp.ne.s32.totalorder %s214_s9, %s1690_s14  ;;  %s1831_s26 = smov [#allocation2]  }
  0x3b   : > { %s1695_s28 = sshll.u32 %s1831_s26, 4  ;;  %s1696_s28 = int_to_ptr.vmem [resolvable:$false] %s1695_s28 }
  0x3c   : > { %s211_s7 = scalar_lea.hbm %s2157_s0, %s1268_s29  ;;  %p1693_p10 = pnand %p1691_p5, %p1679_p0 }
  0x3d   : > { %s1697_s29 = scalar_lea.vmem %s1696_s28, 64  ;;  %p1698_p2 = scmp.lt.s32.totalorder %s214_s9, %s1696_s28 }
  0x3e   : > { %p1694_p1 = pneg %p1693_p10  ;;  %p1699_p6 = scmp.lt.s32.totalorder %s1697_s29, %s1690_s14 }
  0x40   : > { %p1700_p12 = por %p1699_p6, %p1698_p2 }
  0x42   : > { %p1701_p3 = pnand %p1700_p12, %p1694_p1 }
  0x44   : > { %1704 = shalt.err (!%p1701_p3)
}
  0x45   : > { %1477 = dma.hbm_to_vmem [thread:$0]  (!%p1974_p11), %s211_s7, 32, %s214_s9, %s203_s12  }
  0x46   : > { %s1333_s27 = sshll.u32 %s1821_s19, 8  ;;  %s224_s5 = scalar_lea.vmem [#allocation5], %s1269_s11 }
  0x47   : > { %s233_s6 = sshll.u32 %s224_s5, 4  ;;  %s220_s8 = sand.u32 1, %s1825_s20   ;;  %s234_s6 = int_to_ptr.vmem [resolvable:$true] %s233_s6 }
  0x48   : > { %s232_s2 = scalar_lea.hbm %s2141_s1, %s1333_s27  ;;  %s221_s28 = scalar_lea.sflag [#allocation6], %s220_s8 }
  0x49   : > { %s1718_s14 = scalar_lea.vmem %s234_s6, 256  ;;  %s1832_s29 = smov [#allocation5]  }
  0x4a   : > { %p1719_p7 = scmp.ne.s32.totalorder %s234_s6, %s1718_s14  ;;  %s1723_s3 = sshll.u32 %s1832_s29, 4  ;;  %s1724_s3 = int_to_ptr.vmem [resolvable:$false] %s1723_s3 }
  0x4b   : > { %s1725_s7 = scalar_lea.vmem %s1724_s3, 512  ;;  %p1726_p10 = scmp.lt.s32.totalorder %s234_s6, %s1724_s3 }
  0x4c   : > { %p1721_p13 = pnand %p1719_p7, %p1679_p0  ;;  %p1727_p1 = scmp.lt.s32.totalorder %s1725_s7, %s1718_s14 }
  0x4e   : > { %p1722_p5 = pneg %p1721_p13  ;;  %p1728_p2 = por %p1727_p1, %p1726_p10 }
  0x50   : > { %p1729_p6 = pnand %p1728_p2, %p1722_p5 }
  0x52   : > { %1732 = shalt.err (!%p1729_p6)
}
  0x53   : > { %s1833_s9 = smov 64   ;;  %s1834_s0 = smov 4  }
  0x54   : > { %1480 = dma.hbm_to_vmem [thread:$0]  (!%p1974_p11), %s232_s2, 256, %s234_s6, %s221_s28, %s1833_s9, %s1833_s9, %s1834_s0  }
  0x55   : > { %245 = sbr.rel (%p1917_p8) target bundleno = 1050 (0x41a), region = 36  ;;  %s1998_s11 = sand.u32 (!%p1917_p8), 1, %s1809_s16  }
  0x56   : > { %s1273_s12 = sshll.u32 (!%p1917_p8), %s1998_s11, 1  ;;  %s248_s3 = scalar_lea.sflag (!%p1917_p8), [#allocation3], %s1998_s11 }
  0x57   : > { %s2002_s27 = scalar_lea.vmem (!%p1917_p8), [#allocation2], %s1273_s12 }
  0x5a   : > { %1784 = dma.done.wait (%p1907_p4), %s248_s3, 32  }
  0x5b   : > { %1786 = vsyncadd (%p1907_p4), %s248_s3, 4294967264  ;;  %s256_s2 = sand.u32 1, %s1898_s21   ;;  %s1274_s25 = sshll.u32 %s1998_s11, 4 }
  0x5c   : > { %s257_s10 = scalar_lea.sflag [#allocation6], %s256_s2  ;;  %s2010_s5 = scalar_lea.vmem [#allocation5], %s1274_s25 }
  0x5d   : > { %1788 = dma.done.wait (%p1907_p4), %s257_s10, 256  }
  0x5e   : > { %1790 = vsyncadd (%p1907_p4), %s257_s10, 4294967040  ;;  %p2159_p8 = scmp.eq.s32.totalorder %s1898_s21, 0 }
  0x60   : > { %1792 = dma.done.wait (%p2159_p8), [#allocation6], 6144   ;;  %p2160_p11 = pmov %p2159_p8 }
  0x61   : > { %p2161_p0 = pmov %p2159_p8 }
  0x62   : > { %1794 = vsyncadd (%p2160_p11), [#allocation6], 4294961152 }
  0x63   : > { %1796 = dma.done.wait (%p2161_p0), [#allocation9], 256   ;;  %p2162_p12 = pmov %p2161_p0 }
  0x64   : > { %v1835_v0 = vmov 0   ;;  %v1551_v1 = vld [vmem:[#allocation7 + $0x154] ss:$24 sps:$4 sm:$0xff]   ;;  %v1553_v2 = vld [vmem:[#allocation7 + $0x150] ss:$24 sps:$4 sm:$0xff]   ;;  %v388_v27 = vlaneseq  ;;  %v1836_v52 = vmov 0.0  }
  0x65   : > { %1798 = vsyncadd (%p2162_p12), [#allocation9], 4294967040  ;;  %522 = vmatprep.mubr.bf16.mxu0 %v1835_v0  ;;  %490 = vmatprep.subr.bf16.mxu0 %v1551_v1  ;;  %v1554_v3 = vld [vmem:[#allocation7 + $0x124] ss:$24 sps:$4 sm:$0xff]   ;;  %v1556_v4 = vld [vmem:[#allocation7 + $0x120] ss:$24 sps:$4 sm:$0xff]  }
  0x66   : > { %491 = vmatpush1.bf16.msra.mxu0 %v1553_v2  ;;  %v1557_v5 = vld [vmem:[#allocation7 + $0xf4] ss:$24 sps:$4 sm:$0xff]   ;;  %v1559_v6 = vld [vmem:[#allocation7 + $0xf0] ss:$24 sps:$4 sm:$0xff]   ;;  %v1560_v7 = vld [vmem:[#allocation7 + $0xc4] ss:$24 sps:$4 sm:$0xff]  }
  0x67   : > { %492 = vmatprep.subr.bf16.mxu0 %v1554_v3  ;;  %v1562_v8 = vld [vmem:[#allocation7 + $0xc0] ss:$24 sps:$4 sm:$0xff]   ;;  %v1563_v9 = vld [vmem:[#allocation7 + $0x94] ss:$24 sps:$4 sm:$0xff]   ;;  %v1577_v10 = vld [vmem:[#allocation7 + $0x164] ss:$24 sps:$4 sm:$0xff]  }
  0x68   : > { %v1578_v11 = vld [vmem:[#allocation7 + $0x134] ss:$24 sps:$4 sm:$0xff]   ;;  %v1565_v12 = vld [vmem:[#allocation7 + $0x90] ss:$24 sps:$4 sm:$0xff]   ;;  %1373 = vmatprep.subr.bf16.mxu1 %v1577_v10  ;;  %v1566_v13 = vld [vmem:[#allocation7 + $0x64] ss:$24 sps:$4 sm:$0xff]  }
  0x69   : > { %1374 = vmatpush3.bf16.msra.mxu1 %v1577_v10  ;;  %v1568_v14 = vld [vmem:[#allocation7 + $0x60] ss:$24 sps:$4 sm:$0xff]   ;;  %v1579_v15 = vld [vmem:[#allocation7 + $0x104] ss:$24 sps:$4 sm:$0xff]   ;;  %v1569_v16 = vld [vmem:[#allocation7 + $0x34] ss:$24 sps:$4 sm:$0xff]  }
  0x6a   : > { %493 = vmatpush1.bf16.msra.mxu0 %v1556_v4  ;;  %1375 = vmatprep.subr.bf16.mxu1 %v1578_v11  ;;  %v1580_v17 = vld [vmem:[#allocation7 + $0xd4] ss:$24 sps:$4 sm:$0xff]   ;;  %v1571_v18 = vld [vmem:[#allocation7 + $0x30] ss:$24 sps:$4 sm:$0xff]   ;;  %v1572_v19 = vld [vmem:[#allocation7 + $0x4] ss:$24 sps:$4 sm:$0xff]  }
  0x6b   : > { %494 = vmatprep.subr.bf16.mxu0 %v1557_v5  ;;  %v1574_v20 = vld [vmem:[#allocation7] ss:$24 sps:$4 sm:$0xff]   ;;  %v1581_v23 = vld [vmem:[#allocation7 + $0xa4] ss:$24 sps:$4 sm:$0xff]   ;;  %v1582_v24 = vld [vmem:[#allocation7 + $0x74] ss:$24 sps:$4 sm:$0xff]  }
  0x6c   : > { %v1575_v21 = vld [vmem:[%s2010_s5] sm:$0xff]   ;;  %v2026_v22 = vld [vmem:[%s2010_s5 + $0x8] sm:$0xff]   ;;  %v2029_v28 = vshrl.u32 %v388_v27, 7  ;;  %vm1837_vm0 = vmmov 0   ;;  %vm771_vm1 = vcmask 1041409   ;;  %vm773_vm2 = vcmask 1042434  }
  0x6d   : > { %1376 = vmatpush3.bf16.msra.mxu1 %v1578_v11  ;;  %v1583_v25 = vld [vmem:[#allocation7 + $0x44] ss:$24 sps:$4 sm:$0xff]   ;;  %v1584_v26 = vld [vmem:[#allocation7 + $0x14] ss:$24 sps:$4 sm:$0xff]   ;;  %v1585_v51 = vld [vmem:[#allocation7 + $0x158] ss:$24 sps:$4 sm:$0xff]  }
  0x6e   : > { %495 = vmatpush1.bf16.msra.mxu0 %v1559_v6  ;;  %1377 = vmatprep.subr.bf16.mxu1 %v1579_v15  ;;  %v2032_v29 = vsub.s32 0, %v2029_v28  ;;  %v2034_v30 = vld [vmem:[#allocation8] ss:$8 sm:$0x3]  ;;  %v2039_v33 = vld [vmem:[%s2002_s27] sm:$0x3] }
  0x6f   : > { %496 = vmatprep.subr.bf16.mxu0 %v1560_v7  ;;  %v1586_v53 = vld [vmem:[#allocation7 + $0x128] ss:$24 sps:$4 sm:$0xff]   ;;  %v1587_v54 = vld [vmem:[#allocation7 + $0xf8] ss:$24 sps:$4 sm:$0xff]   ;;  %v1593_v60 = vld [vmem:[#allocation7 + $0x15c] ss:$24 sps:$4 sm:$0xff]  }
  0x70   : > { %v391_v31 = vrot.slane %v2034_v30, %v2032_v29  ;;  %v546_v36 = vrot.slane %v2039_v33, %v2032_v29  ;;  %v1588_v55 = vld [vmem:[#allocation7 + $0xc8] ss:$24 sps:$4 sm:$0xff]   ;;  %v1589_v56 = vld [vmem:[#allocation7 + $0x98] ss:$24 sps:$4 sm:$0xff]   ;;  %v1595_v61 = vld [vmem:[#allocation7 + $0x12c] ss:$24 sps:$4 sm:$0xff]  }
  0x71   : > { %1378 = vmatpush3.bf16.msra.mxu1 %v1579_v15  ;;  %v1590_v57 = vld [vmem:[#allocation7 + $0x68] ss:$24 sps:$4 sm:$0xff]   ;;  %v1591_v58 = vld [vmem:[#allocation7 + $0x38] ss:$24 sps:$4 sm:$0xff]   ;;  %v1597_v62 = vld [vmem:[#allocation7 + $0xfc] ss:$24 sps:$4 sm:$0xff]  }
  0x72   : > { %497 = vmatpush1.bf16.msra.mxu0 %v1562_v8  ;;  %1379 = vmatprep.subr.bf16.mxu1 %v1580_v17  ;;  %v1592_v59 = vld [vmem:[#allocation7 + $0x8] ss:$24 sps:$4 sm:$0xff]   ;;  %v1599_v63 = vld [vmem:[#allocation7 + $0xcc] ss:$24 sps:$4 sm:$0xff]   ;;  %v1605_v2 = vld [vmem:[#allocation7 + $0x3c] ss:$24 sps:$4 sm:$0xff]  }
  0x73   : > { %498 = vmatprep.subr.bf16.mxu0 %v1563_v9  ;;  %v1603_v1 = vld [vmem:[#allocation7 + $0x6c] ss:$24 sps:$4 sm:$0xff]   ;;  %vm775_vm3 = vcmask 1043459   ;;  %s1277_s21 = sshll.u32 %s1998_s11, 5  ;;  %s1334_s8 = sshll.u32 %s1817_s18, 9 }
  0x74   : > { %s297_s23 = scalar_lea.vmem [#allocation10], %s1277_s21  ;;  %s2092_s14 = scalar_lea.hbm %s2144_s4, %s1334_s8 }
  0x75   : > { %1380 = vmatpush3.bf16.msra.mxu1 %v1580_v17  ;;  %s1132_s6 = sshll.u32 %s297_s23, 4  ;;  %s1117_s29 = scalar_lea.sflag [#allocation4], %s1998_s11  ;;  %s2087_s6 = int_to_ptr.vmem [resolvable:$true] %s1132_s6 }
  0x76   : > { %499 = vmatpush1.bf16.msra.mxu0 %v1565_v12  ;;  %1381 = vmatprep.subr.bf16.mxu1 %v1581_v23  ;;  %s1733_s18 = scalar_lea.vmem %s2087_s6, 512  ;;  %s1839_s7 = smov [#allocation10]  }
  0x77   : > { %500 = vmatprep.subr.bf16.mxu0 %v1566_v13  ;;  %p1734_p4 = scmp.ne.s32.totalorder %s2087_s6, %s1733_s18  ;;  %s1737_s9 = sshll.u32 %s1839_s7, 4  ;;  %s1738_s9 = int_to_ptr.vmem [resolvable:$false] %s1737_s9 }
  0x78   : > { %s1739_s0 = scalar_lea.vmem %s1738_s9, 1024  ;;  %p1740_p13 = scmp.lt.s32.totalorder %s2087_s6, %s1738_s9 }
  0x79   : > { %1382 = vmatpush3.bf16.msra.mxu1 %v1581_v23  ;;  %p1735_p3 = pnand %p1734_p4, %p1958_p9  ;;  %p1741_p5 = scmp.lt.s32.totalorder %s1739_s0, %s1733_s18 }
  0x7a   : > { %501 = vmatpush1.bf16.msra.mxu0 %v1568_v14  ;;  %1383 = vmatprep.subr.bf16.mxu1 %v1582_v24 }
  0x7b   : > { %502 = vmatprep.subr.bf16.mxu0 %v1569_v16  ;;  %p1736_p7 = pneg %p1735_p3  ;;  %p1742_p10 = por %p1741_p5, %p1740_p13 }
  0x7d   : > { %1384 = vmatpush3.bf16.msra.mxu1 %v1582_v24  ;;  %p1743_p1 = pnand %p1742_p10, %p1736_p7 }
  0x7e   : > { %503 = vmatpush1.bf16.msra.mxu0 %v1571_v18  ;;  %1385 = vmatprep.subr.bf16.mxu1 %v1583_v25 }
  0x7f   : > { %504 = vmatprep.subr.bf16.mxu0 %v1572_v19 }
  0x81   : > { %1386 = vmatpush3.bf16.msra.mxu1 %v1583_v25 }
  0x82   : > { %505 = vmatpush1.bf16.msra.mxu0 %v1574_v20  ;;  %1387 = vmatprep.subr.bf16.mxu1 %v1584_v26 }
  0x83   : > { %1393 = vmatprep.subr.bf16.mxu0 %v1836_v52 }
  0x85   : > { %523 = vmatmul.mubr.bf16.vlgmr.msra.gmra.mxu0 %v1575_v21  ;;  %1388 = vmatpush3.bf16.msra.mxu1 %v1584_v26 }
  0x86   : > { %532 = vmatprep.mubr.bf16.mxu0 %v1835_v0  ;;  %1394 = vmatpush3.bf16.msra.mxu0 %v1585_v51  ;;  %v1601_v0 = vld [vmem:[#allocation7 + $0x9c] ss:$24 sps:$4 sm:$0xff]  }
  0x87   : > { %1395 = vmatprep.subr.bf16.mxu0 %v1836_v52  ;;  %1413 = vmatprep.subr.bf16.mxu1 %v1593_v60 }
  0x8a   : > { %1396 = vmatpush3.bf16.msra.mxu0 %v1586_v53 }
  0x8b   : > { %1397 = vmatprep.subr.bf16.mxu0 %v1836_v52 }
  0x8d   : > { %533 = vmatmul.mubr.bf16.gmra.mxu0 %v2026_v22 }
  0x8e   : > { %1409 = vmatprep.mubr.msk.bf16.mxu0 %vm1837_vm0, %v1836_v52  ;;  %1398 = vmatpush3.bf16.msra.mxu0 %v1587_v54 }
  0x8f   : > { %1399 = vmatprep.subr.bf16.mxu0 %v1836_v52 }
  0x92   : > { %1400 = vmatpush3.bf16.msra.mxu0 %v1588_v55 }
  0x93   : > { %1401 = vmatprep.subr.bf16.mxu0 %v1836_v52 }
  0x96   : > { %1402 = vmatpush3.bf16.msra.mxu0 %v1589_v56 }
  0x97   : > { %1403 = vmatprep.subr.bf16.mxu0 %v1836_v52 }
  0x9a   : > { %1404 = vmatpush3.bf16.msra.mxu0 %v1590_v57 }
  0x9b   : > { %1405 = vmatprep.subr.bf16.mxu0 %v1836_v52 }
  0x9e   : > { %1406 = vmatpush3.bf16.msra.mxu0 %v1591_v58 }
  0x9f   : > { %1407 = vmatprep.subr.bf16.mxu0 %v1836_v52 }
  0xa2   : > { %1408 = vmatpush3.bf16.msra.mxu0 %v1592_v59 }
  0xa3   : > { %1433 = vmatprep.subr.bf16.mxu0 %v1836_v52 }
 0x145   : > { %v524_v32 = vpop.f32.mrf.mxu0 }
 0x146   : > { %v525_v35 = vadd.f32 %v524_v32, %v391_v31 }
 0x147   : > { %v2041_v34 = vpop.f32.mrf.mxu0 }
 0x148   : > { %v547_v40 = vmul.f32 %v546_v36, %v525_v35 }
 0x149   : > { %v528_v37 = vpop.f32.mrf.mxu0 }
 0x14a   : > { %v529_v38 = vadd.f32 %v528_v37, %v391_v31 }
 0x14b   : > { %v2045_v39 = vpop.f32.mrf.mxu0 }
 0x14c   : > { %v548_v41 = vmul.f32 %v546_v36, %v529_v38 }
 0x14d   : > { %v534_v42 = vpop.f32.mrf.mxu0 }
 0x14e   : > { %v551_v43 = vpack.c.bf16 %v548_v41, %v547_v40  ;;  %v535_v45 = vadd.f32 %v534_v42, %v391_v31 }
 0x14f   : > { %v2047_v44 = vpop.f32.mrf.mxu0 }
 0x150   : > { %1389 = vmatprep.mubr.bf16.mxu1 %v551_v43  ;;  %v549_v48 = vmul.f32 %v546_v36, %v535_v45 }
 0x151   : > { %v538_v46 = vpop.f32.mrf.mxu0 }
 0x152   : > { %v539_v47 = vadd.f32 %v538_v46, %v391_v31 }
 0x154   : > { %v550_v49 = vmul.f32 %v546_v36, %v539_v47 }
 0x156   : > { %v552_v50 = vpack.c.bf16 %v550_v49, %v549_v48 }
 0x158   : > { %1390 = vmatmul.mubr.bf16.vlgmr.msra.gmra.mxu1 %v552_v50 }
 0x159   : > { %1429 = vmatprep.mubr.bf16.mxu1 %v1575_v21  ;;  %1414 = vmatpush3.bf16.msra.mxu1 %v1593_v60 }
 0x15a   : > { %1415 = vmatprep.subr.bf16.mxu1 %v1595_v61 }
 0x15d   : > { %1416 = vmatpush3.bf16.msra.mxu1 %v1595_v61 }
 0x15e   : > { %1417 = vmatprep.subr.bf16.mxu1 %v1597_v62 }
 0x161   : > { %1418 = vmatpush3.bf16.msra.mxu1 %v1597_v62 }
 0x162   : > { %1419 = vmatprep.subr.bf16.mxu1 %v1599_v63 }
 0x165   : > { %1420 = vmatpush3.bf16.msra.mxu1 %v1599_v63 }
 0x166   : > { %1421 = vmatprep.subr.bf16.mxu1 %v1601_v0 }
 0x169   : > { %1422 = vmatpush3.bf16.msra.mxu1 %v1601_v0 }
 0x16a   : > { %1423 = vmatprep.subr.bf16.mxu1 %v1603_v1 }
 0x16d   : > { %1424 = vmatpush3.bf16.msra.mxu1 %v1603_v1 }
 0x16e   : > { %1425 = vmatprep.subr.bf16.mxu1 %v1605_v2 }
 0x171   : > { %1426 = vmatpush3.bf16.msra.mxu1 %v1605_v2 }
 0x218   : > { %v1391_v3 = vpop.f32.mrf.mxu1 }
 0x219   : > { %v662_v4 = vrot.slane %v1391_v3, 4 }
 0x21a   : > { %v635_v5 = vpop.f32.mrf.mxu1 }
 0x21b   : > { %v663_v6 = vmax.f32 %v1391_v3, %v662_v4  ;;  %v650_v7 = vrot.slane %v635_v5, 4 }
 0x21c   : > { %v1392_v8 = vpop.f32.mrf.mxu1 }
 0x21d   : > { %v664_v9 = vrot.slane %v663_v6, 2  ;;  %v651_v10 = vmax.f32 %v635_v5, %v650_v7  ;;  %v668_v11 = vrot.slane %v1392_v8, 4 }
 0x21e   : > { %v638_v12 = vpop.f32.mrf.mxu1 }
 0x21f   : > { %v665_v13 = vmax.f32 %v663_v6, %v664_v9  ;;  %v652_v14 = vrot.slane %v651_v10, 2  ;;  %v669_v15 = vmax.f32 %v1392_v8, %v668_v11  ;;  %v656_v16 = vrot.slane %v638_v12, 4 }
 0x221   : > { %v666_v17 = vrot.slane %v665_v13, 1  ;;  %v653_v18 = vmax.f32 %v651_v10, %v652_v14  ;;  %v670_v19 = vrot.slane %v669_v15, 2  ;;  %v657_v20 = vmax.f32 %v638_v12, %v656_v16 }
 0x223   : > { %v667_v21 = vmax.f32 %v665_v13, %v666_v17  ;;  %v654_v23 = vrot.slane %v653_v18, 1  ;;  %v671_v24 = vmax.f32 %v669_v15, %v670_v19  ;;  %v658_v25 = vrot.slane %v657_v20, 2 }
 0x224   : > { %v394_v13 = vsub.s32 1, %v2029_v28 }
 0x225   : > { %v676_v26 = vsub.f32 %v1391_v3, %v667_v21  ;;  %v655_v27 = vmax.f32 %v653_v18, %v654_v23  ;;  %v672_v31 = vrot.slane %v671_v24, 1  ;;  %v659_v32 = vmax.f32 %v657_v20, %v658_v25 }
 0x226   : > { %v395_v19 = vrot.slane %v2034_v30, %v394_v13 }
 0x227   : > { %v682_v35 = vmul.f32 1.442695, %v676_v26  ;;  %v674_v36 = vsub.f32 %v635_v5, %v655_v27  ;;  %v673_v37 = vmax.f32 %v671_v24, %v672_v31  ;;  %v660_v38 = vrot.slane %v659_v32, 1  ;;  %v540_v26 = vpop.f32.mrf.mxu0 }
 0x228   : > { %v537_v25 = vadd.f32 %v2047_v44, %v395_v19 }
 0x229   : > { %1609 = vpow2.f32 %v682_v35  ;;  %v678_v40 = vmul.f32 1.442695, %v674_v36  ;;  %v677_v41 = vsub.f32 %v1392_v8, %v673_v37  ;;  %v661_v42 = vmax.f32 %v659_v32, %v660_v38 }
 0x22a   : > { %v527_v36 = vadd.f32 %v2041_v34, %v395_v19 }
 0x22b   : > { %1611 = vpow2.f32 %v678_v40  ;;  %v684_v43 = vmul.f32 1.442695, %v677_v41  ;;  %v675_v45 = vsub.f32 %v638_v12, %v661_v42  ;;  %v541_v42 = vadd.f32 %v540_v26, %v395_v19  ;;  %v1602_v26 = vld [vmem:[#allocation7 + $0xa0] ss:$24 sps:$4 sm:$0xff]  }
 0x22d   : > { %1613 = vpow2.f32 %v684_v43  ;;  %v680_v46 = vmul.f32 1.442695, %v675_v45 }
 0x22f   : > { %1615 = vpow2.f32 %v680_v46 }
 0x236   : > { %v1610_v47 = vpop.eup %1609 }
 0x237   : > { %v698_v48 = vrot.slane %v1610_v47, 4 }
 0x238   : > { %v1612_v49 = vpop.eup %1611 }
 0x239   : > { %v699_v50 = vadd.f32 %v1610_v47, %v698_v48  ;;  %v686_v51 = vrot.slane %v1612_v49, 4  ;;  %v531_v48 = vadd.f32 %v2045_v39, %v395_v19 }
 0x23a   : > { %v1614_v53 = vpop.eup %1613 }
 0x23b   : > { %v700_v54 = vrot.slane %v699_v50, 2  ;;  %v687_v55 = vadd.f32 %v1612_v49, %v686_v51  ;;  %v704_v56 = vrot.slane %v1614_v53, 4 }
 0x23c   : > { %v1616_v57 = vpop.eup %1615 }
 0x23d   : > { %v688_v58 = vrot.slane %v687_v55, 2  ;;  %v705_v59 = vadd.f32 %v1614_v53, %v704_v56  ;;  %v692_v60 = vrot.slane %v1616_v57, 4  ;;  %v701_v61 = vadd.f32 %v700_v54, %v699_v50 }
 0x23f   : > { %v689_v62 = vadd.f32 %v688_v58, %v687_v55  ;;  %v693_v63 = vadd.f32 %v1616_v57, %v692_v60  ;;  %v702_v0 = vrot.slane %v701_v61, 1  ;;  %v706_v1 = vrot.slane %v705_v59, 2 }
 0x241   : > { %v694_v2 = vrot.slane %v693_v63, 2  ;;  %v690_v3 = vrot.slane %v689_v62, 1  ;;  %v703_v4 = vadd.f32 %v702_v0, %v701_v61  ;;  %v707_v5 = vadd.f32 %v706_v1, %v705_v59 }
 0x243   : > { %v695_v6 = vadd.f32 %v694_v2, %v693_v63  ;;  %v691_v7 = vadd.f32 %v690_v3, %v689_v62  ;;  %v708_v8 = vrot.slane %v707_v5, 1  ;;  %1617 = vrcp.f32 %v703_v4 }
 0x245   : > { %v696_v9 = vrot.slane %v695_v6, 1  ;;  %v709_v10 = vadd.f32 %v708_v8, %v707_v5  ;;  %1619 = vrcp.f32 %v691_v7 }
 0x247   : > { %v697_v11 = vadd.f32 %v696_v9, %v695_v6  ;;  %1621 = vrcp.f32 %v709_v10 }
 0x249   : > { %1623 = vrcp.f32 %v697_v11 }
 0x250   : > { %v1618_v12 = vpop.eup %1617 }
 0x251   : > { %v716_v14 = vmul.f32 %v1618_v12, %v703_v4 }
 0x252   : > { %v1620_v15 = vpop.eup %1619 }
 0x253   : > { %v714_v16 = vmul.f32 %v1620_v15, %v691_v7  ;;  %v720_v17 = vsub.f32 2.0, %v716_v14 }
 0x254   : > { %v1622_v18 = vpop.eup %1621 }
 0x255   : > { %v717_v20 = vmul.f32 %v1622_v18, %v709_v10  ;;  %v718_v21 = vsub.f32 2.0, %v714_v16  ;;  %v724_v23 = vmul.f32 %v1618_v12, %v720_v17 }
 0x256   : > { %v1624_v24 = vpop.eup %1623 }
 0x257   : > { %v715_v27 = vmul.f32 %v1624_v24, %v697_v11  ;;  %v721_v31 = vsub.f32 2.0, %v717_v20  ;;  %v722_v32 = vmul.f32 %v1620_v15, %v718_v21  ;;  %v728_v35 = vmul.f32 %v1610_v47, %v724_v23  ;;  %v1594_v20 = vld [vmem:[#allocation7 + $0x160] ss:$24 sps:$4 sm:$0xff]   ;;  %v1596_v23 = vld [vmem:[#allocation7 + $0x130] ss:$24 sps:$4 sm:$0xff]  }
 0x259   : > { %v719_v37 = vsub.f32 2.0, %v715_v27  ;;  %v725_v38 = vmul.f32 %v1622_v18, %v721_v31  ;;  %v726_v40 = vmul.f32 %v1612_v49, %v722_v32  ;;  %v732_v41 = vmul.f32 %v728_v35, %v537_v25  ;;  %v1600_v25 = vld [vmem:[#allocation7 + $0xd0] ss:$24 sps:$4 sm:$0xff]   ;;  %v1606_v31 = vld [vmem:[#allocation7 + $0x40] ss:$24 sps:$4 sm:$0xff]  }
 0x25a   : > { %v1604_v27 = vld [vmem:[#allocation7 + $0x70] ss:$24 sps:$4 sm:$0xff]   ;;  %v1607_v32 = vld [vmem:[#allocation7 + $0xc] ss:$24 sps:$4 sm:$0xff]  }
 0x25b   : > { %v723_v43 = vmul.f32 %v1624_v24, %v719_v37  ;;  %v729_v30 = vmul.f32 %v1614_v53, %v725_v38  ;;  %v730_v45 = vmul.f32 %v726_v40, %v527_v36  ;;  %v746_v46 = vrot.slane %v732_v41, 4  ;;  %v1598_v24 = vld [vmem:[#allocation7 + $0x100] ss:$24 sps:$4 sm:$0xff]   ;;  %1427 = vmatprep.subr.bf16.mxu1 %v1607_v32  ;;  %v1608_v35 = vld [vmem:[#allocation7 + $0x10] ss:$24 sps:$4 sm:$0xff]  }
 0x25c   : > { %1428 = vmatpush3.bf16.msra.mxu1 %v1607_v32  ;;  %v762_v36 = vld [vmem:[#allocation8 + $0x1] ss:$0 sm:$0xff]  ;;  %v870_v37 = vrot.slane %v2039_v33, %v394_v13 }
 0x25d   : > { %v727_v50 = vmul.f32 %v1616_v57, %v723_v43  ;;  %v733_v44 = vmul.f32 %v729_v30, %v541_v42  ;;  %v734_v51 = vrot.slane %v730_v45, 4  ;;  %v747_v54 = vadd.f32 %v746_v46, %v732_v41 }
 0x25f   : > { %v731_v55 = vmul.f32 %v727_v50, %v531_v48  ;;  %v735_v56 = vadd.f32 %v734_v51, %v730_v45  ;;  %v748_v47 = vrot.slane %v747_v54, 2  ;;  %v752_v58 = vrot.slane %v733_v44, 4  ;;  %1430 = vmatmul.mubr.bf16.vlgmr.msra.gmra.mxu1 %v2026_v22 }
 0x261   : > { %v736_v34 = vrot.slane %v735_v56, 2  ;;  %v740_v59 = vrot.slane %v731_v55, 4  ;;  %v749_v60 = vadd.f32 %v748_v47, %v747_v54  ;;  %v753_v49 = vadd.f32 %v752_v58, %v733_v44 }
 0x263   : > { %v737_v61 = vadd.f32 %v736_v34, %v735_v56  ;;  %v741_v62 = vadd.f32 %v740_v59, %v731_v55  ;;  %v754_v63 = vrot.slane %v753_v49, 2  ;;  %v750_v53 = vrot.slane %v749_v60, 1 }
 0x265   : > { %v738_v0 = vrot.slane %v737_v61, 1  ;;  %v742_v1 = vrot.slane %v741_v62, 2  ;;  %v755_v2 = vadd.f32 %v754_v63, %v753_v49  ;;  %v751_v4 = vadd.f32 %v750_v53, %v749_v60  ;;  %v1107_v60 = vld [vmem:[#allocation8 + $0x2] ss:$0 sm:$0xff] }
 0x267   : > { %v739_v39 = vadd.f32 %v738_v0, %v737_v61  ;;  %v743_v57 = vadd.f32 %v742_v1, %v741_v62  ;;  %v756_v3 = vrot.slane %v755_v2, 1  ;;  %v760_v9 = vpack.c.bf16 %v751_v4, %v751_v4 }
 0x269   : > { %v744_v5 = vrot.slane %v743_v57, 1  ;;  %v757_v6 = vadd.f32 %v756_v3, %v755_v2  ;;  %v758_v8 = vpack.c.bf16 %v739_v39, %v739_v39  ;;  %v769_v15 = vunpack.c.l.b16 %v760_v9 }
 0x26b   : > { %v745_v7 = vadd.f32 %v744_v5, %v743_v57  ;;  %v761_v11 = vpack.c.bf16 %v757_v6, %v757_v6  ;;  %v767_v12 = vunpack.c.l.b16 %v758_v8 }
 0x26d   : > { %v759_v10 = vpack.c.bf16 %v745_v7, %v745_v7  ;;  %v770_v16 = vunpack.c.l.b16 %v761_v11 }
 0x26f   : > { %v768_v14 = vunpack.c.l.b16 %v759_v10 }
 0x271   : > { %v772_v17 = vsel %vm771_vm1, %v768_v14, %v767_v12 }
 0x272   : > { %v774_v18 = vsel %vm773_vm2, %v769_v15, %v772_v17 }
 0x273   : > { %v776_v19 = vsel %vm775_vm3, %v770_v16, %v774_v18 }
 0x274   : > { %v777_v21 = vpack.c.b16 %v776_v19, %v776_v19 }
 0x276   : > { %1410 = vmatmul.mubr.bf16.vlgmr.msra.gmra.mxu0 %v777_v21 }
 0x277   : > { %1434 = vmatpush3.bf16.msra.mxu0 %v1594_v20  ;;  %1449 = vmatprep.mubr.msk.bf16.mxu0 %vm1837_vm0, %v1836_v52 }
 0x278   : > { %1435 = vmatprep.subr.bf16.mxu0 %v1836_v52 }
 0x27b   : > { %1436 = vmatpush3.bf16.msra.mxu0 %v1596_v23 }
 0x27c   : > { %1437 = vmatprep.subr.bf16.mxu0 %v1836_v52 }
 0x27f   : > { %1438 = vmatpush3.bf16.msra.mxu0 %v1598_v24 }
 0x280   : > { %1439 = vmatprep.subr.bf16.mxu0 %v1836_v52 }
 0x283   : > { %1440 = vmatpush3.bf16.msra.mxu0 %v1600_v25 }
 0x284   : > { %1441 = vmatprep.subr.bf16.mxu0 %v1836_v52 }
 0x287   : > { %1442 = vmatpush3.bf16.msra.mxu0 %v1602_v26 }
 0x288   : > { %1443 = vmatprep.subr.bf16.mxu0 %v1836_v52 }
 0x28b   : > { %1444 = vmatpush3.bf16.msra.mxu0 %v1604_v27 }
 0x28c   : > { %1445 = vmatprep.subr.bf16.mxu0 %v1836_v52 }
 0x28f   : > { %1446 = vmatpush3.bf16.msra.mxu0 %v1606_v31 }
 0x290   : > { %1447 = vmatprep.subr.bf16.mxu0 %v1836_v52  ;;  %v1838_v52 = vmov 1966171168  }
 0x291   : > { %v1060_v46 = vunpack.c.l.s4 %v1838_v52 }
 0x293   : > { %1448 = vmatpush3.bf16.msra.mxu0 %v1608_v35  ;;  %v1061_v48 = vunpack.c.0.s8 %v1060_v46 }
 0x295   : > { %v1064_v22 = vsub.s32 %v1061_v48, %v2029_v28 }
 0x31f   : > { %v1431_v50 = vpop.f32.mrf.mxu1 }
 0x321   : > { %v954_v44 = vpop.f32.mrf.mxu1 }
 0x323   : > { %v1432_v56 = vpop.f32.mrf.mxu1 }
 0x325   : > { %v957_v53 = vpop.f32.mrf.mxu1 }
 0x336   : > { %v861_v38 = vpop.f32.mrf.mxu0 }
 0x337   : > { %v862_v40 = vadd.f32 %v861_v38, %v762_v36 }
 0x338   : > { %v1411_v41 = vpop.f32.mrf.mxu0 }
 0x339   : > { %v871_v42 = vadd.f32 %v870_v37, %v862_v40 }
 0x33a   : > { %v864_v43 = vpop.f32.mrf.mxu0 }
 0x33b   : > { %v969_v30 = vpack.c.bf16 %v871_v42, %v871_v42 }
 0x33c   : > { %v1412_v45 = vpop.f32.mrf.mxu0 }
 0x33d   : > { %1450 = vmatmul.mubr.bf16.vlgmr.msra.gmra.mxu0 %v969_v30 }
 0x3fd   : > { %v1052_v51 = vpop.f32.mrf.mxu0 }
 0x3fe   : > { %v1065_v54 = vrot.slane %v1052_v51, %v1064_v22 }
 0x3ff   : > { %v1451_v55 = vpop.f32.mrf.mxu0 }
 0x400   : > { %v1066_v33 = vcombine.high %v1065_v54, %v1065_v54  ;;  %v1073_v13 = vrot.slane %v1065_v54, %v1064_v22 }
 0x401   : > { %v1055_v47 = vpop.f32.mrf.mxu0 }
 0x402   : > { %v1080_v58 = vrot.slane %v1066_v33, %v1064_v22  ;;  %v1081_v34 = vcombine.high %v1073_v13, %v1073_v13  ;;  %v1086_v59 = vrot.slane %v1073_v13, %v2032_v29 }
 0x403   : > { %v1452_v49 = vpop.f32.mrf.mxu0 }
 0x404   : > { %v1094_v61 = vrot.slane %v1081_v34, %v2032_v29  ;;  %v1103_v62 = vadd.f32 %v1086_v59, %v954_v44  ;;  %v1082_v28 = vcombine.high %v1080_v58, %v1080_v58  ;;  %v1090_v63 = vrot.slane %v1080_v58, %v2032_v29 }
 0x406   : > { %v1105_v0 = vadd.f32 %v1431_v50, %v1094_v61  ;;  %v1098_v1 = vrot.slane %v1082_v28, %v2032_v29  ;;  %v1108_v2 = vadd.f32 %v1107_v60, %v1103_v62  ;;  %v1104_v39 = vadd.f32 %v1090_v63, %v957_v53 }
 0x408   : > { %v1106_v57 = vadd.f32 %v1432_v56, %v1098_v1  ;;  %v1110_v3 = vadd.f32 %v1107_v60, %v1105_v0  ;;  %1112 = vst [vmem:[%s297_s23] sm:$0xff] %v1108_v2  ;;  %v1109_v4 = vadd.f32 %v1107_v60, %v1104_v39 }
 0x40a   : > { %v1111_v5 = vadd.f32 %v1107_v60, %v1106_v57  ;;  %1114 = vst [vmem:[%s297_s23 + $0x10] sm:$0xff] %v1110_v3  ;;  %1113 = vst [vmem:[%s297_s23 + $0x8] sm:$0xff] %v1109_v4 }
 0x40c   : > { %1115 = vst [vmem:[%s297_s23 + $0x18] sm:$0xff] %v1111_v5 }
 0x40d   : > { %1746 = shalt.err (!%p1743_p1)
}
 0x40e   : > { %s1747_s12 = scalar_lea.hbm %s2092_s14, 512  ;;  %s1751_s2 = scalar_lea.hbm %s2144_s4, 1024 }
 0x40f   : > { %p1748_p2 = scmp.ne.s32.totalorder %s2092_s14, %s1747_s12  ;;  %p1752_p11 = scmp.lt.s32.totalorder %s2092_s14, %s2144_s4 }
 0x410   : > { %p1753_p0 = scmp.lt.s32.totalorder %s1751_s2, %s1747_s12 }
 0x411   : > { %p1749_p6 = pnand %p1748_p2, %p1958_p9 }
 0x412   : > { %p1754_p12 = por %p1753_p0, %p1752_p11 }
 0x413   : > { %p1750_p8 = pneg %p1749_p6 }
 0x415   : > { %p1755_p4 = pnand %p1754_p12, %p1750_p8 }
 0x417   : > { %1758 = shalt.err (!%p1755_p4)
}
 0x418   : > { %s1840_s5 = smov 128   ;;  %s1841_s21 = smov 8  }
 0x419   : > { %1465 = dma.vmem_to_hbm [thread:$0]  (%p1958_p9), %s2087_s6, 512, %s2092_s14, %s1117_s29, %s1840_s5, %s1840_s5, %s1841_s21  }
 0x41a PF: > { %s1147_s23 = sand.u32 1, %s1805_s15   ;;  %p2163_p3 = scmp.ne.s32.totalorder %s2150_s24, 0 }
 0x41b   : > { %p2164_p7 = scmp.ge.s32.totalorder %s1825_s20, 2  ;;  %s1148_s8 = scalar_lea.sflag [#allocation4], %s1147_s23 }
 0x41d   : > { %p1482_p13 = pnand %p2164_p7, %p2163_p3 }
 0x41f   : > { %p1483_p5 = pneg %p1482_p13 }
 0x421   : > { %1800 = dma.done.wait (%p1483_p5), %s1148_s8, 512  }
 0x422   : > { %1802 = vsyncadd (%p1483_p5), %s1148_s8, 4294966784  ;;  %s24_s20 = sadd.s32 1, %s1825_s20   ;;  %s2165_s15 = smov %s1809_s16 }
 0x423   : > { %p21_p10 = scmp.ge.s32.totalorder %s24_s20, 4   ;;  %s2166_s16 = smov %s1813_s17 }
 0x424   : > { %s2167_s17 = smov %s1967_s30  ;;  %s2168_s18 = smov %s1821_s19 }
 0x425   : > { %s2169_s19 = smov %s2171_s13  ;;  %23 = sbr.rel (!%p21_p10) target bundleno = 13 (0xd), region = 102 }
 0x42a   :  { %1153 = vsyncpa [#allocation3], 1 }
 0x42b   :  { %1155 = vsyncpa [#allocation3 + $0x1], 1 }
 0x42c   :  { %1156 = vsyncpa [#allocation6], 1 }
 0x42d   :  { %1158 = vsyncpa [#allocation6 + $0x1], 1 }
 0x42e   :  { %1159 = vsyncpa [#allocation9], 1 }
 0x42f   :  { %1160 = vsyncpa [#allocation4], 1 }
 0x430   :  { %1162 = vsyncpa [#allocation4 + $0x1], 1 }

</bundles_post_ra>
